<compile_context>
chip_gen: v5e
topology: v5e:2x2
jax: 0.10.0
libtpu: 0.0.40
codegen_flags: <defaults>
</compile_context>

<pallas_src>
import functools

import jax
import jax.numpy as jnp
from jax.experimental import pallas as pl
from jax.experimental.pallas import tpu as pltpu

LANE = 128          # lane width (last dim)
SUBLANE_BF16 = 16   # sublane granularity for packed bf16 tiles


def _round_up(n, m):
    return ((n + m - 1) // m) * m


def _mlp_kernel(x_ref,
                w1_ref, b1_ref,
                w2_ref, b2_ref,
                w3_ref, b3_ref,
                w4_ref, b4_ref,
                out_ref):
    """Fused forward: relu(relu(relu(x@W1+b1)@W2+b2)@W3+b3)@W4+b4.

    x / weights are bf16 MXU operands; accumulation, bias-add and ReLU are f32.
    All feature dims are pre-padded to multiples of 128 (lane-dense).
    """
    x = x_ref[...]

    h = jnp.dot(x, w1_ref[...], preferred_element_type=jnp.float32) + b1_ref[...]
    h = jnp.maximum(h, 0.0).astype(jnp.bfloat16)

    h = jnp.dot(h, w2_ref[...], preferred_element_type=jnp.float32) + b2_ref[...]
    h = jnp.maximum(h, 0.0).astype(jnp.bfloat16)

    h = jnp.dot(h, w3_ref[...], preferred_element_type=jnp.float32) + b3_ref[...]
    h = jnp.maximum(h, 0.0).astype(jnp.bfloat16)

    out = jnp.dot(h, w4_ref[...], preferred_element_type=jnp.float32) + b4_ref[...]
    out_ref[...] = out.astype(out_ref.dtype)


@functools.partial(jax.jit, static_argnames=("batch_tile",))
def mlp_forward(x, params, *, batch_tile=512):
    """x: [B, state_size] float32. params: dict of [in,out] weights / (1,out) biases."""
    B, state_size = x.shape
    w1, b1 = params["w1"], params["b1"]
    w2, b2 = params["w2"], params["b2"]
    w3, b3 = params["w3"], params["b3"]
    w4, b4 = params["w4"], params["b4"]
    action_size = w4.shape[1]

    # --- lane-pad all feature dims to multiples of 128 -------------------------
    S = _round_up(state_size, LANE)
    H1 = _round_up(w1.shape[1], LANE)
    H2 = _round_up(w2.shape[1], LANE)
    H3 = _round_up(w3.shape[1], LANE)
    A = _round_up(action_size, LANE)

    def pad2(a, rows, cols, dtype):
        a = a.astype(dtype)
        return jnp.pad(a, ((0, rows - a.shape[0]), (0, cols - a.shape[1])))

    w1p = pad2(w1, S, H1, jnp.bfloat16)
    w2p = pad2(w2, H1, H2, jnp.bfloat16)
    w3p = pad2(w3, H2, H3, jnp.bfloat16)
    w4p = pad2(w4, H3, A, jnp.bfloat16)
    b1p = pad2(b1, 1, H1, jnp.float32)
    b2p = pad2(b2, 1, H2, jnp.float32)
    b3p = pad2(b3, 1, H3, jnp.float32)
    b4p = pad2(b4, 1, A, jnp.float32)

    # --- batch tiling: big tiles, ragged batch handled by padding --------------
    bt = min(batch_tile, _round_up(B, SUBLANE_BF16))
    bt = _round_up(bt, SUBLANE_BF16)
    Bp = _round_up(B, bt)
    xp = pad2(x, Bp, S, jnp.bfloat16)

    grid = (Bp // bt,)

    # Advisory cost hint so XLA schedules/overlaps this small custom call well.
    flops = 2 * Bp * (S * H1 + H1 * H2 + H2 * H3 + H3 * A)
    bytes_accessed = (xp.size * 2
                      + (w1p.size + w2p.size + w3p.size + w4p.size) * 2
                      + (b1p.size + b2p.size + b3p.size + b4p.size) * 4
                      + Bp * A * 4)
    cost = pl.CostEstimate(flops=flops, transcendentals=0,
                           bytes_accessed=bytes_accessed)

    # Weights/biases: constant block index -> stay resident in VMEM across steps.
    def full(shape):
        return pl.BlockSpec(shape, lambda i: (0,) * len(shape))

    out_padded = pl.pallas_call(
        _mlp_kernel,
        out_shape=jax.ShapeDtypeStruct((Bp, A), jnp.float32),
        grid_spec=pltpu.PrefetchScalarGridSpec(
            num_scalar_prefetch=0,
            grid=grid,
            in_specs=[
                pl.BlockSpec((bt, S), lambda i: (i, 0)),
                full(w1p.shape), full(b1p.shape),
                full(w2p.shape), full(b2p.shape),
                full(w3p.shape), full(b3p.shape),
                full(w4p.shape), full(b4p.shape),
            ],
            out_specs=pl.BlockSpec((bt, A), lambda i: (i, 0)),
        ),
        compiler_params=pltpu.CompilerParams(
            dimension_semantics=("parallel",)),
        cost_estimate=cost,
    )(xp, w1p, b1p, w2p, b2p, w3p, b3p, w4p, b4p)

    return out_padded[:B, :action_size]


def init_mlp_params(key, state_size, action_size,
                    layer1_units=100, layer2_units=100, layer3_units=100):
    """Deterministic init mirroring nn.Linear's default U(-1/sqrt(fan_in), +1/sqrt(fan_in))."""
    dims = [state_size, layer1_units, layer2_units, layer3_units, action_size]
    params = {}
    for idx in range(4):
        fan_in, fan_out = dims[idx], dims[idx + 1]
        key, kw, kb = jax.random.split(key, 3)
        bound = 1.0 / jnp.sqrt(jnp.float32(fan_in))
        # Stored as [in, out]; PyTorch stores [out, in] — same distribution, transposed layout.
        params[f"w{idx + 1}"] = jax.random.uniform(
            kw, (fan_in, fan_out), jnp.float32, -bound, bound)
        params[f"b{idx + 1}"] = jax.random.uniform(
            kb, (1, fan_out), jnp.float32, -bound, bound)
    return params


def mlp_forward_ref_bf16(x, params):
    """Pure-JAX reference with the same bf16-operand / f32-accumulate math."""
    def layer(h, w, b, relu):
        y = jnp.dot(h.astype(jnp.bfloat16), w.astype(jnp.bfloat16),
                    preferred_element_type=jnp.float32) + b
        return jnp.maximum(y, 0.0) if relu else y
    h = layer(x, params["w1"], params["b1"], True)
    h = layer(h, params["w2"], params["b2"], True)
    h = layer(h, params["w3"], params["b3"], True)
    return layer(h, params["w4"], params["b4"], False)


def mlp_forward_ref_f32(x, params):
    """Full-f32 reference (matches the PyTorch module exactly)."""
    h = jnp.maximum(x @ params["w1"] + params["b1"], 0.0)
    h = jnp.maximum(h @ params["w2"] + params["b2"], 0.0)
    h = jnp.maximum(h @ params["w3"] + params["b3"], 0.0)
    return h @ params["w4"] + params["b4"]


if __name__ == "__main__":
    key = jax.random.PRNGKey(0)
    k_params, k_x = jax.random.split(key)

    batch = 64
    state_size = 16
    action_size = 4
    hidden = 32

    params = init_mlp_params(k_params, state_size, action_size,
                             layer1_units=hidden,
                             layer2_units=hidden,
                             layer3_units=hidden)
    x = jax.random.normal(k_x, (batch, state_size), jnp.float32)

    # batch_tile=32 -> 2 parallel grid steps at this small demo size
    # (production default batch_tile=512 amortizes the ~0.35 us/step overhead).
    out = mlp_forward(x, params, batch_tile=32)
    out = jax.block_until_ready(out)

    assert out.shape == (batch, action_size)

    ref_bf16 = mlp_forward_ref_bf16(x, params)
    assert jnp.allclose(out, ref_bf16, atol=2e-3, rtol=2e-3), \
        "mismatch vs bf16-operand reference"

    ref_f32 = mlp_forward_ref_f32(x, params)
    assert jnp.allclose(out, ref_f32, atol=5e-2, rtol=5e-2), \
        "mismatch vs f32 reference"

    print("KERNEL_OK")
</pallas_src>

<mosaic_0001>
module attributes {stable_mosaic.version = 11 : i64} {
  func.func @_mlp_kernel(%arg0: i32, %arg1: memref<32x128xbf16, #tpu.memory_space<vmem>>, %arg2: memref<128x128xbf16, #tpu.memory_space<vmem>>, %arg3: memref<1x128xf32, #tpu.memory_space<vmem>>, %arg4: memref<128x128xbf16, #tpu.memory_space<vmem>>, %arg5: memref<1x128xf32, #tpu.memory_space<vmem>>, %arg6: memref<128x128xbf16, #tpu.memory_space<vmem>>, %arg7: memref<1x128xf32, #tpu.memory_space<vmem>>, %arg8: memref<128x128xbf16, #tpu.memory_space<vmem>>, %arg9: memref<1x128xf32, #tpu.memory_space<vmem>>, %arg10: memref<32x128xf32, #tpu.memory_space<vmem>>) attributes {dimension_semantics = [#tpu.dimension_semantics<parallel>], iteration_bounds = array<i64: 2>, scalar_prefetch = 0 : i64, scratch_operands = 0 : i64, tpu.core_type = #tpu.core_type<tc>, window_params = [{transform_indices = @transform_0, window_bounds = array<i64: 32, 128>}, {pipeline_mode = #tpu.pipeline_mode<synchronous>, transform_indices = @transform_1, window_bounds = array<i64: 128, 128>}, {pipeline_mode = #tpu.pipeline_mode<synchronous>, transform_indices = @transform_2, window_bounds = array<i64: 1, 128>}, {pipeline_mode = #tpu.pipeline_mode<synchronous>, transform_indices = @transform_3, window_bounds = array<i64: 128, 128>}, {pipeline_mode = #tpu.pipeline_mode<synchronous>, transform_indices = @transform_4, window_bounds = array<i64: 1, 128>}, {pipeline_mode = #tpu.pipeline_mode<synchronous>, transform_indices = @transform_5, window_bounds = array<i64: 128, 128>}, {pipeline_mode = #tpu.pipeline_mode<synchronous>, transform_indices = @transform_6, window_bounds = array<i64: 1, 128>}, {pipeline_mode = #tpu.pipeline_mode<synchronous>, transform_indices = @transform_7, window_bounds = array<i64: 128, 128>}, {pipeline_mode = #tpu.pipeline_mode<synchronous>, transform_indices = @transform_8, window_bounds = array<i64: 1, 128>}, {transform_indices = @transform_9, window_bounds = array<i64: 32, 128>}]} {
    %c0 = arith.constant 0 : index
    %c0_0 = arith.constant 0 : index
    %0 = vector.load %arg1[%c0, %c0_0] : memref<32x128xbf16, #tpu.memory_space<vmem>>, vector<32x128xbf16>
    %c0_1 = arith.constant 0 : index
    %c0_2 = arith.constant 0 : index
    %1 = vector.load %arg2[%c0_1, %c0_2] : memref<128x128xbf16, #tpu.memory_space<vmem>>, vector<128x128xbf16>
    %cst = arith.constant dense<0.000000e+00> : vector<32x128xf32>
    %2 = tpu.matmul %0, %1, %cst {dimension_numbers = #tpu.dot_dimension_numbers<[1], [0], [0], [1], [0, 0, 1, 1], [], []>} : vector<32x128xbf16>, vector<128x128xbf16>, vector<32x128xf32> -> vector<32x128xf32>
    %c0_3 = arith.constant 0 : index
    %c0_4 = arith.constant 0 : index
    %3 = vector.load %arg3[%c0_3, %c0_4] : memref<1x128xf32, #tpu.memory_space<vmem>>, vector<1x128xf32>
    %4 = vector.broadcast %3 : vector<1x128xf32> to vector<32x128xf32>
    %5 = arith.addf %2, %4 : vector<32x128xf32>
    %cst_5 = arith.constant 0.000000e+00 : f32
    %6 = vector.broadcast %cst_5 : f32 to vector<32x128xf32>
    %7 = arith.maximumf %5, %6 : vector<32x128xf32>
    %8 = arith.truncf %7 : vector<32x128xf32> to vector<32x128xbf16>
    %c0_6 = arith.constant 0 : index
    %c0_7 = arith.constant 0 : index
    %9 = vector.load %arg4[%c0_6, %c0_7] : memref<128x128xbf16, #tpu.memory_space<vmem>>, vector<128x128xbf16>
    %cst_8 = arith.constant dense<0.000000e+00> : vector<32x128xf32>
    %10 = tpu.matmul %8, %9, %cst_8 {dimension_numbers = #tpu.dot_dimension_numbers<[1], [0], [0], [1], [0, 0, 1, 1], [], []>} : vector<32x128xbf16>, vector<128x128xbf16>, vector<32x128xf32> -> vector<32x128xf32>
    %c0_9 = arith.constant 0 : index
    %c0_10 = arith.constant 0 : index
    %11 = vector.load %arg5[%c0_9, %c0_10] : memref<1x128xf32, #tpu.memory_space<vmem>>, vector<1x128xf32>
    %12 = vector.broadcast %11 : vector<1x128xf32> to vector<32x128xf32>
    %13 = arith.addf %10, %12 : vector<32x128xf32>
    %cst_11 = arith.constant 0.000000e+00 : f32
    %14 = vector.broadcast %cst_11 : f32 to vector<32x128xf32>
    %15 = arith.maximumf %13, %14 : vector<32x128xf32>
    %16 = arith.truncf %15 : vector<32x128xf32> to vector<32x128xbf16>
    %c0_12 = arith.constant 0 : index
    %c0_13 = arith.constant 0 : index
    %17 = vector.load %arg6[%c0_12, %c0_13] : memref<128x128xbf16, #tpu.memory_space<vmem>>, vector<128x128xbf16>
    %cst_14 = arith.constant dense<0.000000e+00> : vector<32x128xf32>
    %18 = tpu.matmul %16, %17, %cst_14 {dimension_numbers = #tpu.dot_dimension_numbers<[1], [0], [0], [1], [0, 0, 1, 1], [], []>} : vector<32x128xbf16>, vector<128x128xbf16>, vector<32x128xf32> -> vector<32x128xf32>
    %c0_15 = arith.constant 0 : index
    %c0_16 = arith.constant 0 : index
    %19 = vector.load %arg7[%c0_15, %c0_16] : memref<1x128xf32, #tpu.memory_space<vmem>>, vector<1x128xf32>
    %20 = vector.broadcast %19 : vector<1x128xf32> to vector<32x128xf32>
    %21 = arith.addf %18, %20 : vector<32x128xf32>
    %cst_17 = arith.constant 0.000000e+00 : f32
    %22 = vector.broadcast %cst_17 : f32 to vector<32x128xf32>
    %23 = arith.maximumf %21, %22 : vector<32x128xf32>
    %24 = arith.truncf %23 : vector<32x128xf32> to vector<32x128xbf16>
    %c0_18 = arith.constant 0 : index
    %c0_19 = arith.constant 0 : index
    %25 = vector.load %arg8[%c0_18, %c0_19] : memref<128x128xbf16, #tpu.memory_space<vmem>>, vector<128x128xbf16>
    %cst_20 = arith.constant dense<0.000000e+00> : vector<32x128xf32>
    %26 = tpu.matmul %24, %25, %cst_20 {dimension_numbers = #tpu.dot_dimension_numbers<[1], [0], [0], [1], [0, 0, 1, 1], [], []>} : vector<32x128xbf16>, vector<128x128xbf16>, vector<32x128xf32> -> vector<32x128xf32>
    %c0_21 = arith.constant 0 : index
    %c0_22 = arith.constant 0 : index
    %27 = vector.load %arg9[%c0_21, %c0_22] : memref<1x128xf32, #tpu.memory_space<vmem>>, vector<1x128xf32>
    %28 = vector.broadcast %27 : vector<1x128xf32> to vector<32x128xf32>
    %29 = arith.addf %26, %28 : vector<32x128xf32>
    %c0_23 = arith.constant 0 : index
    %c0_24 = arith.constant 0 : index
    %30 = vector.load %arg10[%c0_23, %c0_24] : memref<32x128xf32, #tpu.memory_space<vmem>>, vector<32x128xf32>
    tpu.vector_store %arg10[%c0_23, %c0_24], %29 {strides = array<i32>} : memref<32x128xf32, #tpu.memory_space<vmem>>, vector<32x128xf32>,
    return
  }
  func.func @transform_0(%arg0: i32) -> (i32, i32) {
    %c0_i32 = arith.constant 0 : i32
    %c0_i32_0 = arith.constant 0 : i32
    return %arg0, %c0_i32 : i32, i32
  }
  func.func @transform_1(%arg0: i32) -> (i32, i32) {
    %c0_i32 = arith.constant 0 : i32
    %c0_i32_0 = arith.constant 0 : i32
    %c0_i32_1 = arith.constant 0 : i32
    return %c0_i32, %c0_i32_0 : i32, i32
  }
  func.func @transform_2(%arg0: i32) -> (i32, i32) {
    %c0_i32 = arith.constant 0 : i32
    %c0_i32_0 = arith.constant 0 : i32
    %c0_i32_1 = arith.constant 0 : i32
    return %c0_i32, %c0_i32_0 : i32, i32
  }
  func.func @transform_3(%arg0: i32) -> (i32, i32) {
    %c0_i32 = arith.constant 0 : i32
    %c0_i32_0 = arith.constant 0 : i32
    %c0_i32_1 = arith.constant 0 : i32
    return %c0_i32, %c0_i32_0 : i32, i32
  }
  func.func @transform_4(%arg0: i32) -> (i32, i32) {
    %c0_i32 = arith.constant 0 : i32
    %c0_i32_0 = arith.constant 0 : i32
    %c0_i32_1 = arith.constant 0 : i32
    return %c0_i32, %c0_i32_0 : i32, i32
  }
  func.func @transform_5(%arg0: i32) -> (i32, i32) {
    %c0_i32 = arith.constant 0 : i32
    %c0_i32_0 = arith.constant 0 : i32
    %c0_i32_1 = arith.constant 0 : i32
    return %c0_i32, %c0_i32_0 : i32, i32
  }
  func.func @transform_6(%arg0: i32) -> (i32, i32) {
    %c0_i32 = arith.constant 0 : i32
    %c0_i32_0 = arith.constant 0 : i32
    %c0_i32_1 = arith.constant 0 : i32
    return %c0_i32, %c0_i32_0 : i32, i32
  }
  func.func @transform_7(%arg0: i32) -> (i32, i32) {
    %c0_i32 = arith.constant 0 : i32
    %c0_i32_0 = arith.constant 0 : i32
    %c0_i32_1 = arith.constant 0 : i32
    return %c0_i32, %c0_i32_0 : i32, i32
  }
  func.func @transform_8(%arg0: i32) -> (i32, i32) {
    %c0_i32 = arith.constant 0 : i32
    %c0_i32_0 = arith.constant 0 : i32
    %c0_i32_1 = arith.constant 0 : i32
    return %c0_i32, %c0_i32_0 : i32, i32
  }
  func.func @transform_9(%arg0: i32) -> (i32, i32) {
    %c0_i32 = arith.constant 0 : i32
    %c0_i32_0 = arith.constant 0 : i32
    return %arg0, %c0_i32 : i32, i32
  }
}

</mosaic_0001>

<bundles_post_ra>
// kernel: mlp_forward.1
= control target key start
LH: loop header
LB: loop body
LE: loop exit
PB: predicated region body
PF: predicated region fallthrough
CT: control target
= control target key end

     0   :  { %s1029_s30 = smov 0   ;;  %s1158_s0 = inlined_call_operand.vmem [shape: bf16[64,128], index: 0, kind: input, shape index: {}]   ;;  %s1159_s1 = inlined_call_operand.vmem [shape: bf16[128,128], index: 1, kind: input, shape index: {}]   ;;  %s1160_s2 = inlined_call_operand.vmem [shape: f32[1,128], index: 2, kind: input, shape index: {}]   ;;  %s1161_s3 = inlined_call_operand.vmem [shape: bf16[128,128], index: 3, kind: input, shape index: {}]   ;;  %s1162_s4 = inlined_call_operand.vmem [shape: f32[1,128], index: 4, kind: input, shape index: {}]   ;;  %s1163_s5 = inlined_call_operand.vmem [shape: bf16[128,128], index: 5, kind: input, shape index: {}]   ;;  %s1164_s6 = inlined_call_operand.vmem [shape: f32[1,128], index: 6, kind: input, shape index: {}]   ;;  %s1165_s7 = inlined_call_operand.vmem [shape: bf16[128,128], index: 7, kind: input, shape index: {}]   ;;  %s1166_s8 = inlined_call_operand.vmem [shape: f32[1,128], index: 8, kind: input, shape index: {}]   ;;  %s1167_s9 = inlined_call_operand.vmem [shape: f32[64,128], index: 9, kind: output, shape index: {}]  }
   0x1 LB: > { %s778_s10 = sadd.s32 4294967295, %s977_s30   ;;  %p782_p0 = scmp.ge.s32.totalorder %s977_s30, 1  ;;  %s977_s30 = sphi %s1029_s30, %s19_s30  }
   0x2   : > { %p288_p1 = scmp.lt.s32.totalorder %s977_s30, 3 }
   0x4   : > { %p289_p2 = pnand %p782_p0, %p288_p1 }
   0x5   : > { %s783_s19 = sshll.u32 (!%p289_p2), %s778_s10, 2 }
   0x6   : > { %292 = sbr.rel (%p289_p2) target bundleno = 628 (0x274), region = 56  ;;  %p325_p3 = scmp.lt.s32.totalorder (!%p289_p2), %s783_s19, 7 }
   0xb   : > { %v934_v0 = vld [vmem:[%s1159_s1 + $0x38] sm:$0xff]  ;;  %v933_v1 = vld [vmem:[%s1159_s1 + $0x30] sm:$0xff]  ;;  %v932_v2 = vld [vmem:[%s1159_s1 + $0x28] sm:$0xff]  ;;  %s1169_s19 = smov (!%p325_p3, %s783_s19), 7 }
   0xc   : > { %420 = vmatpush.bf16.msra.mxu0 %v934_v0  ;;  %v931_v3 = vld [vmem:[%s1159_s1 + $0x20] sm:$0xff]  ;;  %v930_v4 = vld [vmem:[%s1159_s1 + $0x18] sm:$0xff]  ;;  %v929_v6 = vld [vmem:[%s1159_s1 + $0x10] sm:$0xff]  ;;  %s784_s10 = sshll.u32 %s1169_s19, 2  ;;  %s786_s29 = sshll.u32 %s1169_s19, 3 }
   0xd   : > { %v942_v5 = vld [vmem:[%s1161_s3 + $0x38] sm:$0xff]  ;;  %v941_v7 = vld [vmem:[%s1161_s3 + $0x30] sm:$0xff]  ;;  %v928_v8 = vld [vmem:[%s1159_s1 + $0x8] sm:$0xff]  ;;  %s328_s17 = scalar_lea.vmem %s1158_s0, %s784_s10  ;;  %s334_s14 = scalar_lea.vmem %s1167_s9, %s786_s29 }
   0xe   : > { %513 = vmatpush.bf16.msra.mxu1 %v942_v5  ;;  %v940_v9 = vld [vmem:[%s1161_s3 + $0x28] sm:$0xff]  ;;  %v927_v10 = vld [vmem:[%s1159_s1] sm:$0xff]  ;;  %v938_v14 = vld [vmem:[%s1161_s3 + $0x18] sm:$0xff] }
   0xf   : > { %v939_v11 = vld [vmem:[%s1161_s3 + $0x20] sm:$0xff]  ;;  %v926_v13 = vld [vmem:[%s328_s17 + $0x8] sm:$0xff]  ;;  %v937_v15 = vld [vmem:[%s1161_s3 + $0x10] sm:$0xff] }
  0x10   : > { %421 = vmatpush.bf16.msra.mxu0 %v933_v1  ;;  %v925_v12 = vld [vmem:[%s328_s17] sm:$0xff]  ;;  %v936_v16 = vld [vmem:[%s1161_s3 + $0x8] sm:$0xff]  ;;  %v950_v18 = vld [vmem:[%s1163_s5 + $0x38] sm:$0xff] }
  0x11   : > { %v935_v17 = vld [vmem:[%s1161_s3] sm:$0xff]  ;;  %606 = vmatpush.bf16.msra.mxu2 %v950_v18  ;;  %v949_v20 = vld [vmem:[%s1163_s5 + $0x30] sm:$0xff]  ;;  %v948_v22 = vld [vmem:[%s1163_s5 + $0x28] sm:$0xff] }
  0x12   : > { %514 = vmatpush.bf16.msra.mxu1 %v941_v7  ;;  %v967_v21 = vld [vmem:[%s1160_s2] ss:$0 sm:$0xff]  ;;  %v946_v37 = vld [vmem:[%s1163_s5 + $0x18] sm:$0xff]  ;;  %v945_v38 = vld [vmem:[%s1163_s5 + $0x10] sm:$0xff] }
  0x13   : > { %v947_v26 = vld [vmem:[%s1163_s5 + $0x20] sm:$0xff]  ;;  %v944_v39 = vld [vmem:[%s1163_s5 + $0x8] sm:$0xff]  ;;  %v958_v41 = vld [vmem:[%s1165_s7 + $0x38] sm:$0xff] }
  0x14   : > { %422 = vmatpush.bf16.msra.mxu0 %v932_v2  ;;  %v943_v40 = vld [vmem:[%s1163_s5] sm:$0xff]  ;;  %699 = vmatpush.bf16.msra.mxu3 %v958_v41  ;;  %v957_v43 = vld [vmem:[%s1165_s7 + $0x30] sm:$0xff]  ;;  %v956_v45 = vld [vmem:[%s1165_s7 + $0x28] sm:$0xff] }
  0x15   : > { %607 = vmatpush.bf16.msra.mxu2 %v949_v20  ;;  %v968_v44 = vld [vmem:[%s1162_s4] ss:$0 sm:$0xff]  ;;  %v954_v60 = vld [vmem:[%s1165_s7 + $0x18] sm:$0xff]  ;;  %v953_v61 = vld [vmem:[%s1165_s7 + $0x10] sm:$0xff] }
  0x16   : > { %515 = vmatpush.bf16.msra.mxu1 %v940_v9  ;;  %v955_v49 = vld [vmem:[%s1165_s7 + $0x20] sm:$0xff]  ;;  %v952_v62 = vld [vmem:[%s1165_s7 + $0x8] sm:$0xff] }
  0x17   : > { %v951_v63 = vld [vmem:[%s1165_s7] sm:$0xff] }
  0x18   : > { %423 = vmatpush.bf16.msra.mxu0 %v931_v3  ;;  %700 = vmatpush.bf16.msra.mxu3 %v957_v43  ;;  %v969_v1 = vld [vmem:[%s1164_s6] ss:$0 sm:$0xff] }
  0x19   : > { %608 = vmatpush.bf16.msra.mxu2 %v948_v22 }
  0x1a   : > { %516 = vmatpush.bf16.msra.mxu1 %v939_v11 }
  0x1c   : > { %424 = vmatpush.bf16.msra.mxu0 %v930_v4  ;;  %701 = vmatpush.bf16.msra.mxu3 %v956_v45 }
  0x1d   : > { %609 = vmatpush.bf16.msra.mxu2 %v947_v26 }
  0x1e   : > { %517 = vmatpush.bf16.msra.mxu1 %v938_v14 }
  0x20   : > { %425 = vmatpush.bf16.msra.mxu0 %v929_v6  ;;  %702 = vmatpush.bf16.msra.mxu3 %v955_v49 }
  0x21   : > { %610 = vmatpush.bf16.msra.mxu2 %v946_v37 }
  0x22   : > { %518 = vmatpush.bf16.msra.mxu1 %v937_v15  ;;  %v970_v15 = vld [vmem:[%s1166_s8] ss:$0 sm:$0xff] }
  0x24   : > { %426 = vmatpush.bf16.msra.mxu0 %v928_v8  ;;  %703 = vmatpush.bf16.msra.mxu3 %v954_v60 }
  0x25   : > { %611 = vmatpush.bf16.msra.mxu2 %v945_v38 }
  0x26   : > { %519 = vmatpush.bf16.msra.mxu1 %v936_v16 }
  0x28   : > { %427 = vmatpush.bf16.msra.mxu0 %v927_v10  ;;  %704 = vmatpush.bf16.msra.mxu3 %v953_v61 }
  0x29   : > { %612 = vmatpush.bf16.msra.mxu2 %v944_v39 }
  0x2a   : > { %520 = vmatpush.bf16.msra.mxu1 %v935_v17 }
  0x2b   : > { %428 = vmatmul.bf16.vlgmr.msra.gmra.mxu0 %v925_v12 }
  0x2c   : > { %705 = vmatpush.bf16.msra.mxu3 %v952_v62 }
  0x2d   : > { %613 = vmatpush.bf16.msra.mxu2 %v943_v40 }
  0x30   : > { %706 = vmatpush.bf16.msra.mxu3 %v951_v63 }
  0x3b   : > { %433 = vmatmul.bf16.gmra.mxu0 %v926_v13 }
  0xa8   : > { %v429_v19 = vpop.f32.mrf.mxu0 }
  0xa9   : > { %v430_v23 = vadd.f32 %v967_v21, %v429_v19 }
  0xab   : > { %v439_v27 = vmax.f32 %v430_v23, 0.0 }
  0xb0   : > { %v431_v24 = vpop.f32.mrf.mxu0 }
  0xb1   : > { %v432_v25 = vadd.f32 %v967_v21, %v431_v24 }
  0xb3   : > { %v440_v28 = vmax.f32 %v432_v25, 0.0 }
  0xb5   : > { %v443_v29 = vpack.c.bf16 %v440_v28, %v439_v27 }
  0xb7   : > { %521 = vmatmul.bf16.vlgmr.msra.gmra.mxu1 %v443_v29 }
  0xb8   : > { %v434_v30 = vpop.f32.mrf.mxu0 }
  0xb9   : > { %v435_v31 = vadd.f32 %v967_v21, %v434_v30 }
  0xbb   : > { %v441_v34 = vmax.f32 %v435_v31, 0.0 }
  0xc0   : > { %v436_v32 = vpop.f32.mrf.mxu0 }
  0xc1   : > { %v437_v33 = vadd.f32 %v967_v21, %v436_v32 }
  0xc3   : > { %v442_v35 = vmax.f32 %v437_v33, 0.0 }
  0xc5   : > { %v444_v36 = vpack.c.bf16 %v442_v35, %v441_v34 }
  0xc7   : > { %526 = vmatmul.bf16.gmra.mxu1 %v444_v36 }
 0x134   : > { %v522_v42 = vpop.f32.mrf.mxu1 }
 0x135   : > { %v523_v46 = vadd.f32 %v968_v44, %v522_v42 }
 0x137   : > { %v532_v50 = vmax.f32 %v523_v46, 0.0 }
 0x13c   : > { %v524_v47 = vpop.f32.mrf.mxu1 }
 0x13d   : > { %v525_v48 = vadd.f32 %v968_v44, %v524_v47 }
 0x13f   : > { %v533_v51 = vmax.f32 %v525_v48, 0.0 }
 0x141   : > { %v536_v52 = vpack.c.bf16 %v533_v51, %v532_v50 }
 0x143   : > { %614 = vmatmul.bf16.vlgmr.msra.gmra.mxu2 %v536_v52 }
 0x144   : > { %v527_v53 = vpop.f32.mrf.mxu1 }
 0x145   : > { %v528_v54 = vadd.f32 %v968_v44, %v527_v53 }
 0x147   : > { %v534_v57 = vmax.f32 %v528_v54, 0.0 }
 0x14c   : > { %v529_v55 = vpop.f32.mrf.mxu1 }
 0x14d   : > { %v530_v56 = vadd.f32 %v968_v44, %v529_v55 }
 0x14f   : > { %v535_v58 = vmax.f32 %v530_v56, 0.0 }
 0x151   : > { %v537_v59 = vpack.c.bf16 %v535_v58, %v534_v57 }
 0x153   : > { %619 = vmatmul.bf16.gmra.mxu2 %v537_v59 }
 0x1c6   : > { %v615_v0 = vpop.f32.mrf.mxu2 }
 0x1c7   : > { %v616_v2 = vadd.f32 %v969_v1, %v615_v0 }
 0x1c9   : > { %v625_v5 = vmax.f32 %v616_v2, 0.0 }
 0x1ce   : > { %v617_v3 = vpop.f32.mrf.mxu2 }
 0x1cf   : > { %v618_v4 = vadd.f32 %v969_v1, %v617_v3 }
 0x1d1   : > { %v626_v6 = vmax.f32 %v618_v4, 0.0 }
 0x1d3   : > { %v629_v7 = vpack.c.bf16 %v626_v6, %v625_v5 }
 0x1d5   : > { %707 = vmatmul.bf16.vlgmr.msra.gmra.mxu3 %v629_v7 }
 0x1d6   : > { %v620_v8 = vpop.f32.mrf.mxu2 }
 0x1d7   : > { %v621_v9 = vadd.f32 %v969_v1, %v620_v8 }
 0x1d9   : > { %v627_v12 = vmax.f32 %v621_v9, 0.0 }
 0x1de   : > { %v622_v10 = vpop.f32.mrf.mxu2 }
 0x1df   : > { %v623_v11 = vadd.f32 %v969_v1, %v622_v10 }
 0x1e1   : > { %v628_v13 = vmax.f32 %v623_v11, 0.0 }
 0x1e3   : > { %v630_v14 = vpack.c.bf16 %v628_v13, %v627_v12 }
 0x1e5   : > { %712 = vmatmul.bf16.gmra.mxu3 %v630_v14 }
 0x258   : > { %v708_v16 = vpop.f32.mrf.mxu3 }
 0x259   : > { %v709_v17 = vadd.f32 %v970_v15, %v708_v16 }
 0x25b   : > { %718 = vst [vmem:[%s334_s14] sm:$0xff] %v709_v17 }
 0x260   : > { %v710_v18 = vpop.f32.mrf.mxu3 }
 0x261   : > { %v711_v19 = vadd.f32 %v970_v15, %v710_v18 }
 0x263   : > { %719 = vst [vmem:[%s334_s14 + $0x8] sm:$0xff] %v711_v19 }
 0x268   : > { %v713_v20 = vpop.f32.mrf.mxu3 }
 0x269   : > { %v714_v21 = vadd.f32 %v970_v15, %v713_v20 }
 0x26b   : > { %720 = vst [vmem:[%s334_s14 + $0x10] sm:$0xff] %v714_v21 }
 0x270   : > { %v715_v22 = vpop.f32.mrf.mxu3 }
 0x271   : > { %v716_v23 = vadd.f32 %v970_v15, %v715_v22 }
 0x273   : > { %721 = vst [vmem:[%s334_s14 + $0x18] sm:$0xff] %v716_v23 }
 0x274 PF: > { %s19_s30 = sadd.s32 1, %s977_s30  }
 0x275   : > { %p16_p4 = scmp.ge.s32.totalorder %s19_s30, 4  }
 0x277   :  { %18 = sbr.rel (!%p16_p4) target bundleno = 1 (0x1), region = 86 }

</bundles_post_ra>
